<compile_context>
chip_gen: v7x
topology: tpu7x:2x2x1
jax: 0.10.0
libtpu: 0.0.40
codegen_flags: <defaults>
</compile_context>

<pallas_src>
import numpy as np
import jax
import jax.numpy as jnp
from jax import lax
from jax.experimental import pallas as pl
from jax.experimental.pallas import tpu as pltpu


def _round_up(x, m):
    return ((x + m - 1) // m) * m


def _packed_dft_w(W, Whp, dtype):
    """[Cw | Sw] with only the non-redundant W//2+1 columns, zero padded to Whp."""
    Wh = W // 2 + 1
    w = np.arange(W, dtype=np.float64)[:, None]
    v = np.arange(Wh, dtype=np.float64)[None, :]
    ang = 2.0 * np.pi * w * v / W
    m = np.zeros((W, 2 * Whp), np.float64)
    m[:, :Wh] = np.cos(ang)
    m[:, Whp:Whp + Wh] = np.sin(ang)
    return jnp.asarray(m, dtype=dtype)


def _packed_dft_h_t(H, Hp, dtype):
    """[Ch ; Sh] stacked along rows, (2*Hp, H), zero rows for padded frequencies."""
    k = np.arange(H, dtype=np.float64)
    ang = 2.0 * np.pi * np.outer(k, k) / H
    m = np.zeros((2 * Hp, H), np.float64)
    m[:H, :] = np.cos(ang)
    m[Hp:Hp + H, :] = np.sin(ang)
    return jnp.asarray(m, dtype=dtype)


def _dft_loss_kernel(x_ref, mw_ref, mht_ref, out_ref, y_ref, acc_ref):
    TB, _, H, W = x_ref.shape
    Whp = mw_ref.shape[1] // 2      # padded half-spectrum width (multiple of 128)
    Hp = mht_ref.shape[0] // 2      # padded H spectrum height (multiple of 8)
    Wh = W // 2 + 1

    # Stage 1: W-direction half-spectrum DFT for all 2*TB images in one matmul.
    x2d = x_ref[...].reshape(2 * TB * H, W)
    y_ref[...] = jnp.dot(x2d, mw_ref[...],
                         preferred_element_type=jnp.float32).astype(y_ref.dtype)

    acc_ref[...] = jnp.zeros_like(acc_ref)
    mht = mht_ref[...]              # [Ch ; Sh], hoisted out of the pair loop

    def magnitude(img):
        start = img * H
        if H % 8 == 0:
            start = pl.multiple_of(start, 8)
        yb = y_ref[pl.ds(start, H), :]                              # (H, 2*Whp)
        # Stage 2: H-direction DFT with the DFT matrix on the left (no transpose).
        z = jnp.dot(mht, yb, preferred_element_type=jnp.float32)    # (2*Hp, 2*Whp)
        re = z[:Hp, :Whp] - z[Hp:, Whp:]        # Ch X Cw - Sh X Sw
        im = z[Hp:, :Whp] + z[:Hp, Whp:]        # Sh X Cw + Ch X Sw (sign-free)
        return jnp.sqrt(re * re + im * im)

    def pair_body(j, carry):
        mag_p = magnitude(2 * j)          # pred_j
        mag_t = magnitude(2 * j + 1)      # true_j
        d = mag_t - mag_p
        ad = jnp.abs(d)
        acc_ref[...] += d * d + jnp.where(ad < 1.0, 0.5 * d * d, ad - 0.5)
        return carry

    lax.fori_loop(0, TB, pair_body, 0)

    # Conjugate-symmetry column weights along the W-frequency (lane) axis.
    vidx = lax.broadcasted_iota(jnp.int32, (Hp, Whp), 1)
    w2 = jnp.where(vidx == 0, 1.0, 2.0)
    if W % 2 == 0:
        w2 = jnp.where(vidx == Wh - 1, 1.0, w2)
    w2 = jnp.where(vidx >= Wh, 0.0, w2).astype(jnp.float32)

    total = jnp.sum(acc_ref[...] * w2)
    out_ref[...] = jnp.full((1, 8, 128), total, dtype=jnp.float32)


def _step_vmem_bytes(tb, H, W, Hp, Whp, in_bytes):
    """Per-grid-step VMEM working set (counts double buffers, scratch, temps)."""
    f32 = 4
    x_block = 2 * (tb * 2 * H * W) * in_bytes              # input block, 2 buffers
    mats = 2 * (W * 2 * Whp + 2 * Hp * H) * in_bytes       # DFT matrices, 2 buffers
    out_blk = 2 * (8 * 128) * f32                          # per-step scalar tile
    y_scr = (2 * tb * H) * (2 * Whp) * in_bytes            # stage-1 result scratch
    acc_scr = Hp * Whp * f32                               # loss accumulator
    temps = ((tb * 2 * H * W) * in_bytes                   # loaded x block
             + (2 * tb * H) * (2 * Whp) * f32              # f32 stage-1 product
             + (2 * (2 * Hp) * (2 * Whp) + 8 * Hp * Whp) * f32)  # z / re / im / mag / d / f
    return x_block + mats + out_blk + y_scr + acc_scr + temps


def _pick_tb(bc, H, W, Hp, Whp, in_bytes, budget_bytes):
    cap = max(1, min(bc, 64))
    tb = 1
    for t in range(1, cap + 1):
        if _step_vmem_bytes(t, H, W, Hp, Whp, in_bytes) <= budget_bytes:
            tb = t
    # Keep at least 2 grid steps when possible (both v7x TensorCores busy,
    # and the pipeline has steps to overlap).
    tb = min(tb, max(1, -(-bc // 2)))
    return tb


def _vmem_budgets():
    """(tile-picker budget, CompilerParams vmem_limit) derived from the chip."""
    try:
        cap = int(pltpu.get_tpu_info().vmem_capacity_bytes)
    except Exception:
        cap = 64 * 1024 * 1024          # conservative fallback (v7x-sized VMEM)
    limit = min(cap * 3 // 4, 96 * 1024 * 1024)   # ~48 MiB on v7x, 96 MiB on v5e/v6e
    budget = int(limit * 0.6)                      # headroom for compiler scratch
    return budget, limit


def dft_loss(pred, true, *, use_bf16_matmul=None, vmem_budget_bytes=None):
    """pred, true: (B, C, H, W) float -> scalar float32 loss (DFTLoss.forward)."""
    B, C, H, W = pred.shape
    bc = B * C
    if use_bf16_matmul is None:
        # bf16 operands run the MXU at full rate on v5e/v6e/v7x; accumulation and
        # the magnitude / smooth-L1 epilogue stay in f32.
        use_bf16_matmul = True
    in_dtype = jnp.bfloat16 if use_bf16_matmul else jnp.float32
    in_bytes = 2 if use_bf16_matmul else 4

    Wh = W // 2 + 1
    Whp = _round_up(Wh, 128)       # lane-aligned half spectrum (pad columns weight 0)
    Hp = _round_up(H, 8)           # sublane-aligned full H spectrum

    mw = _packed_dft_w(W, Whp, in_dtype)      # (W, 2*Whp)   [Cw | Sw]
    mht = _packed_dft_h_t(H, Hp, in_dtype)    # (2*Hp, H)    [Ch ; Sh]

    budget, vmem_limit = _vmem_budgets()
    if vmem_budget_bytes is not None:
        budget = vmem_budget_bytes
    TB = _pick_tb(bc, H, W, Hp, Whp, in_bytes, budget)
    vmem_limit = max(vmem_limit,
                     int(1.25 * _step_vmem_bytes(TB, H, W, Hp, Whp, in_bytes)))
    # TODO(synk): for very large H/W (>= ~1024, where the H-DFT matrix alone is
    # tens of MiB) tile the DFT matmuls over K with an accumulator grid axis
    # instead of holding full matrices in VMEM (needed earliest on v7x).

    bc_pad = _round_up(bc, TB)
    nsteps = bc_pad // TB

    # Single stacked input: (bc, 2, H, W) with pred at [:, 0] and true at [:, 1];
    # zero-padded image pairs contribute exactly 0 to the loss.
    x = jnp.stack([pred.reshape(bc, H, W), true.reshape(bc, H, W)],
                  axis=1).astype(in_dtype)
    if bc_pad != bc:
        x = jnp.concatenate(
            [x, jnp.zeros((bc_pad - bc, 2, H, W), in_dtype)], axis=0)

    x_spec = pl.BlockSpec((TB, 2, H, W), lambda i: (i, 0, 0, 0))
    mw_spec = pl.BlockSpec((W, 2 * Whp), lambda i: (0, 0))
    mht_spec = pl.BlockSpec((2 * Hp, H), lambda i: (0, 0))
    out_spec = pl.BlockSpec((1, 8, 128), lambda i: (i, 0, 0))

    partials = pl.pallas_call(
        _dft_loss_kernel,
        out_shape=jax.ShapeDtypeStruct((nsteps, 8, 128), jnp.float32),
        grid_spec=pltpu.PrefetchScalarGridSpec(
            num_scalar_prefetch=0,
            grid=(nsteps,),
            in_specs=[x_spec, mw_spec, mht_spec],
            out_specs=out_spec,
            scratch_shapes=[
                pltpu.VMEM((2 * TB * H, 2 * Whp), in_dtype),   # stage-1 result
                pltpu.VMEM((Hp, Whp), jnp.float32),            # loss accumulator
            ],
        ),
        compiler_params=pltpu.CompilerParams(
            dimension_semantics=("parallel",),
            vmem_limit_bytes=int(vmem_limit),
        ),
    )(x, mw, mht)

    return 1e-4 * jnp.sum(partials[:, 0, 0])


def _reference_loss(pred, true):
    """Pure-JAX reference mirroring the PyTorch module."""
    pm = jnp.abs(jnp.fft.fft2(pred))
    tm = jnp.abs(jnp.fft.fft2(true))
    d = tm - pm
    mse = jnp.sum(d * d)
    ad = jnp.abs(d)
    sl1 = jnp.sum(jnp.where(ad < 1.0, 0.5 * d * d, ad - 0.5))
    return 1e-4 * (mse + sl1)


if __name__ == "__main__":
    key = jax.random.PRNGKey(0)
    k1, k2 = jax.random.split(key)
    B, C, H, W = 2, 4, 16, 16
    pred = jax.random.normal(k1, (B, C, H, W), dtype=jnp.float32)
    true = jax.random.normal(k2, (B, C, H, W), dtype=jnp.float32)

    ref = jax.block_until_ready(_reference_loss(pred, true))

    # Exact path (f32 matmuls) against the FFT reference.
    loss_f32 = jax.block_until_ready(dft_loss(pred, true, use_bf16_matmul=False))
    assert np.isfinite(float(loss_f32)), "non-finite f32 loss"
    assert np.allclose(float(loss_f32), float(ref), rtol=2e-3, atol=1e-4), (
        f"f32 mismatch: kernel={float(loss_f32)} ref={float(ref)}")

    # Default throughput path (bf16 matmul operands, f32 accumulation/epilogue).
    loss_bf16 = jax.block_until_ready(dft_loss(pred, true))
    assert np.isfinite(float(loss_bf16)), "non-finite bf16 loss"
    assert np.allclose(float(loss_bf16), float(ref), rtol=1e-1, atol=1e-3), (
        f"bf16 mismatch: kernel={float(loss_bf16)} ref={float(ref)}")

    print("KERNEL_OK")
</pallas_src>

<mosaic_0001>
module attributes {stable_mosaic.version = 11 : i64} {
  func.func @_dft_loss_kernel(%arg0: i32, %arg1: memref<4x2x16x16xf32, #tpu.memory_space<vmem>>, %arg2: memref<16x256xf32, #tpu.memory_space<vmem>>, %arg3: memref<32x16xf32, #tpu.memory_space<vmem>>, %arg4: memref<1x8x128xf32, #tpu.memory_space<vmem>>, %arg5: memref<128x256xf32, #tpu.memory_space<vmem>>, %arg6: memref<16x128xf32, #tpu.memory_space<vmem>>) attributes {dimension_semantics = [#tpu.dimension_semantics<parallel>], iteration_bounds = array<i64: 2>, scalar_prefetch = 0 : i64, scratch_operands = 2 : i64, tpu.core_type = #tpu.core_type<tc>, window_params = [{transform_indices = @transform_0, window_bounds = array<i64: 4, 2, 16, 16>}, {pipeline_mode = #tpu.pipeline_mode<synchronous>, transform_indices = @transform_1, window_bounds = array<i64: 16, 256>}, {pipeline_mode = #tpu.pipeline_mode<synchronous>, transform_indices = @transform_2, window_bounds = array<i64: 32, 16>}, {transform_indices = @transform_3, window_bounds = array<i64: 1, 8, 128>}]} {
    %c0 = arith.constant 0 : index
    %c0_0 = arith.constant 0 : index
    %c0_1 = arith.constant 0 : index
    %c0_2 = arith.constant 0 : index
    %0 = vector.load %arg1[%c0, %c0_0, %c0_1, %c0_2] : memref<4x2x16x16xf32, #tpu.memory_space<vmem>>, vector<4x2x16x16xf32>
    %1 = vector.shape_cast %0 : vector<4x2x16x16xf32> to vector<128x16xf32>
    %c0_3 = arith.constant 0 : index
    %c0_4 = arith.constant 0 : index
    %2 = vector.load %arg2[%c0_3, %c0_4] : memref<16x256xf32, #tpu.memory_space<vmem>>, vector<16x256xf32>
    %cst = arith.constant dense<0.000000e+00> : vector<128x256xf32>
    %3 = tpu.matmul %1, %2, %cst {dimension_numbers = #tpu.dot_dimension_numbers<[1], [0], [0], [1], [0, 0, 1, 1], [], []>} : vector<128x16xf32>, vector<16x256xf32>, vector<128x256xf32> -> vector<128x256xf32>
    %c0_5 = arith.constant 0 : index
    %c0_6 = arith.constant 0 : index
    %4 = vector.load %arg5[%c0_5, %c0_6] : memref<128x256xf32, #tpu.memory_space<vmem>>, vector<128x256xf32>
    tpu.vector_store %arg5[%c0_5, %c0_6], %3 {strides = array<i32>} : memref<128x256xf32, #tpu.memory_space<vmem>>, vector<128x256xf32>,
    %cst_7 = arith.constant 0.000000e+00 : f32
    %5 = vector.broadcast %cst_7 : f32 to vector<16x128xf32>
    %c0_8 = arith.constant 0 : index
    %c0_9 = arith.constant 0 : index
    %6 = vector.load %arg6[%c0_8, %c0_9] : memref<16x128xf32, #tpu.memory_space<vmem>>, vector<16x128xf32>
    tpu.vector_store %arg6[%c0_8, %c0_9], %5 {strides = array<i32>} : memref<16x128xf32, #tpu.memory_space<vmem>>, vector<16x128xf32>,
    %c0_10 = arith.constant 0 : index
    %c0_11 = arith.constant 0 : index
    %7 = vector.load %arg3[%c0_10, %c0_11] : memref<32x16xf32, #tpu.memory_space<vmem>>, vector<32x16xf32>
    %c0_i32 = arith.constant 0 : i32
    %c4_i32 = arith.constant 4 : i32
    %8 = arith.addi %c0_i32, %c4_i32 : i32
    %c1_i32 = arith.constant 1 : i32
    scf.for %arg7 = %c0_i32 to %8 step %c1_i32  : i32 {
      %c2_i32 = arith.constant 2 : i32
      %31 = arith.muli %c2_i32, %arg7 : i32
      %c16_i32 = arith.constant 16 : i32
      %32 = arith.muli %31, %c16_i32 : i32
      %33 = tpu.assume_multiple %32, 8 : i32
      %34 = arith.index_cast %33 : i32 to index
      %c0_24 = arith.constant 0 : index
      %35 = vector.load %arg5[%34, %c0_24] : memref<128x256xf32, #tpu.memory_space<vmem>>, vector<16x256xf32>
      %cst_25 = arith.constant dense<0.000000e+00> : vector<32x256xf32>
      %36 = tpu.matmul %7, %35, %cst_25 {dimension_numbers = #tpu.dot_dimension_numbers<[1], [0], [0], [1], [0, 0, 1, 1], [], []>} : vector<32x16xf32>, vector<16x256xf32>, vector<32x256xf32> -> vector<32x256xf32>
      %37 = vector.extract_strided_slice %36 {offsets = [0, 0], sizes = [16, 128], strides = [1, 1]} : vector<32x256xf32> to vector<16x128xf32>
      %38 = vector.extract_strided_slice %36 {offsets = [16, 128], sizes = [16, 128], strides = [1, 1]} : vector<32x256xf32> to vector<16x128xf32>
      %39 = arith.subf %37, %38 : vector<16x128xf32>
      %40 = vector.extract_strided_slice %36 {offsets = [16, 0], sizes = [16, 128], strides = [1, 1]} : vector<32x256xf32> to vector<16x128xf32>
      %41 = vector.extract_strided_slice %36 {offsets = [0, 128], sizes = [16, 128], strides = [1, 1]} : vector<32x256xf32> to vector<16x128xf32>
      %42 = arith.addf %40, %41 : vector<16x128xf32>
      %43 = arith.mulf %39, %39 : vector<16x128xf32>
      %44 = arith.mulf %42, %42 : vector<16x128xf32>
      %45 = arith.addf %43, %44 : vector<16x128xf32>
      %46 = math.sqrt %45 : vector<16x128xf32>
      %c2_i32_26 = arith.constant 2 : i32
      %47 = arith.muli %c2_i32_26, %arg7 : i32
      %c1_i32_27 = arith.constant 1 : i32
      %48 = arith.addi %47, %c1_i32_27 : i32
      %c16_i32_28 = arith.constant 16 : i32
      %49 = arith.muli %48, %c16_i32_28 : i32
      %50 = tpu.assume_multiple %49, 8 : i32
      %51 = arith.index_cast %50 : i32 to index
      %c0_29 = arith.constant 0 : index
      %52 = vector.load %arg5[%51, %c0_29] : memref<128x256xf32, #tpu.memory_space<vmem>>, vector<16x256xf32>
      %cst_30 = arith.constant dense<0.000000e+00> : vector<32x256xf32>
      %53 = tpu.matmul %7, %52, %cst_30 {dimension_numbers = #tpu.dot_dimension_numbers<[1], [0], [0], [1], [0, 0, 1, 1], [], []>} : vector<32x16xf32>, vector<16x256xf32>, vector<32x256xf32> -> vector<32x256xf32>
      %54 = vector.extract_strided_slice %53 {offsets = [0, 0], sizes = [16, 128], strides = [1, 1]} : vector<32x256xf32> to vector<16x128xf32>
      %55 = vector.extract_strided_slice %53 {offsets = [16, 128], sizes = [16, 128], strides = [1, 1]} : vector<32x256xf32> to vector<16x128xf32>
      %56 = arith.subf %54, %55 : vector<16x128xf32>
      %57 = vector.extract_strided_slice %53 {offsets = [16, 0], sizes = [16, 128], strides = [1, 1]} : vector<32x256xf32> to vector<16x128xf32>
      %58 = vector.extract_strided_slice %53 {offsets = [0, 128], sizes = [16, 128], strides = [1, 1]} : vector<32x256xf32> to vector<16x128xf32>
      %59 = arith.addf %57, %58 : vector<16x128xf32>
      %60 = arith.mulf %56, %56 : vector<16x128xf32>
      %61 = arith.mulf %59, %59 : vector<16x128xf32>
      %62 = arith.addf %60, %61 : vector<16x128xf32>
      %63 = math.sqrt %62 : vector<16x128xf32>
      %64 = arith.subf %63, %46 : vector<16x128xf32>
      %65 = math.absf %64 : vector<16x128xf32>
      %c0_31 = arith.constant 0 : index
      %c0_32 = arith.constant 0 : index
      %66 = vector.load %arg6[%c0_31, %c0_32] : memref<16x128xf32, #tpu.memory_space<vmem>>, vector<16x128xf32>
      %67 = arith.mulf %64, %64 : vector<16x128xf32>
      %cst_33 = arith.constant 1.000000e+00 : f32
      %68 = vector.broadcast %cst_33 : f32 to vector<16x128xf32>
      %69 = arith.cmpf olt, %65, %68 : vector<16x128xf32>
      %cst_34 = arith.constant 5.000000e-01 : f32
      %70 = vector.broadcast %cst_34 : f32 to vector<16x128xf32>
      %71 = arith.mulf %70, %64 : vector<16x128xf32>
      %72 = arith.mulf %71, %64 : vector<16x128xf32>
      %cst_35 = arith.constant 5.000000e-01 : f32
      %73 = vector.broadcast %cst_35 : f32 to vector<16x128xf32>
      %74 = arith.subf %65, %73 : vector<16x128xf32>
      %75 = arith.select %69, %72, %74 : vector<16x128xi1>, vector<16x128xf32>
      %76 = arith.addf %67, %75 : vector<16x128xf32>
      %77 = arith.addf %66, %76 : vector<16x128xf32>
      %c0_36 = arith.constant 0 : index
      %c0_37 = arith.constant 0 : index
      %78 = vector.load %arg6[%c0_36, %c0_37] : memref<16x128xf32, #tpu.memory_space<vmem>>, vector<16x128xf32>
      tpu.vector_store %arg6[%c0_36, %c0_37], %77 {strides = array<i32>} : memref<16x128xf32, #tpu.memory_space<vmem>>, vector<16x128xf32>,
    }
    %c4_i32_12 = arith.constant 4 : i32
    %9 = tpu.iota {dimensions = array<i32: 1>} : vector<16x128xi32>
    %c0_i32_13 = arith.constant 0 : i32
    %10 = vector.broadcast %c0_i32_13 : i32 to vector<16x128xi32>
    %11 = arith.cmpi eq, %9, %10 : vector<16x128xi32>
    %cst_14 = arith.constant 1.000000e+00 : f32
    %cst_15 = arith.constant 2.000000e+00 : f32
    %12 = vector.broadcast %cst_14 : f32 to vector<16x128xf32>
    %13 = vector.broadcast %cst_15 : f32 to vector<16x128xf32>
    %14 = arith.select %11, %12, %13 : vector<16x128xi1>, vector<16x128xf32>
    %c8_i32 = arith.constant 8 : i32
    %15 = vector.broadcast %c8_i32 : i32 to vector<16x128xi32>
    %16 = arith.cmpi eq, %9, %15 : vector<16x128xi32>
    %cst_16 = arith.constant 1.000000e+00 : f32
    %17 = vector.broadcast %cst_16 : f32 to vector<16x128xf32>
    %18 = arith.select %16, %17, %14 : vector<16x128xi1>, vector<16x128xf32>
    %c9_i32 = arith.constant 9 : i32
    %19 = vector.broadcast %c9_i32 : i32 to vector<16x128xi32>
    %20 = arith.cmpi sge, %9, %19 : vector<16x128xi32>
    %cst_17 = arith.constant 0.000000e+00 : f32
    %21 = vector.broadcast %cst_17 : f32 to vector<16x128xf32>
    %22 = arith.select %20, %21, %18 : vector<16x128xi1>, vector<16x128xf32>
    %c0_18 = arith.constant 0 : index
    %c0_19 = arith.constant 0 : index
    %23 = vector.load %arg6[%c0_18, %c0_19] : memref<16x128xf32, #tpu.memory_space<vmem>>, vector<16x128xf32>
    %24 = arith.mulf %23, %22 : vector<16x128xf32>
    %25 = vector.shape_cast %24 : vector<16x128xf32> to vector<1x16x128xf32>
    %cst_20 = arith.constant dense<0.000000e+00> : vector<1xf32>
    %26 = vector.multi_reduction <add>, %25, %cst_20 [1, 2] : vector<1x16x128xf32> to vector<1xf32>
    %27 = vector.shape_cast %26 : vector<1xf32> to vector<1x1x1xf32>
    %28 = vector.extract %27[0, 0, 0] : f32 from vector<1x1x1xf32>
    %29 = vector.broadcast %28 : f32 to vector<1x8x128xf32>
    %c0_21 = arith.constant 0 : index
    %c0_22 = arith.constant 0 : index
    %c0_23 = arith.constant 0 : index
    %30 = vector.load %arg4[%c0_21, %c0_22, %c0_23] : memref<1x8x128xf32, #tpu.memory_space<vmem>>, vector<1x8x128xf32>
    tpu.vector_store %arg4[%c0_21, %c0_22, %c0_23], %29 {strides = array<i32>} : memref<1x8x128xf32, #tpu.memory_space<vmem>>, vector<1x8x128xf32>,
    return
  }
  func.func @transform_0(%arg0: i32) -> (i32, i32, i32, i32) {
    %c0_i32 = arith.constant 0 : i32
    %c0_i32_0 = arith.constant 0 : i32
    %c0_i32_1 = arith.constant 0 : i32
    %c0_i32_2 = arith.constant 0 : i32
    return %arg0, %c0_i32, %c0_i32_0, %c0_i32_1 : i32, i32, i32, i32
  }
  func.func @transform_1(%arg0: i32) -> (i32, i32) {
    %c0_i32 = arith.constant 0 : i32
    %c0_i32_0 = arith.constant 0 : i32
    %c0_i32_1 = arith.constant 0 : i32
    return %c0_i32, %c0_i32_0 : i32, i32
  }
  func.func @transform_2(%arg0: i32) -> (i32, i32) {
    %c0_i32 = arith.constant 0 : i32
    %c0_i32_0 = arith.constant 0 : i32
    %c0_i32_1 = arith.constant 0 : i32
    return %c0_i32, %c0_i32_0 : i32, i32
  }
  func.func @transform_3(%arg0: i32) -> (i32, i32, i32) {
    %c0_i32 = arith.constant 0 : i32
    %c0_i32_0 = arith.constant 0 : i32
    %c0_i32_1 = arith.constant 0 : i32
    return %arg0, %c0_i32, %c0_i32_0 : i32, i32, i32
  }
}

</mosaic_0001>

<bundles_post_ra>
// kernel: tpu_custom_call.1
= control target key start
LH: loop header
LB: loop body
LE: loop exit
PB: predicated region body
PF: predicated region fallthrough
CT: control target
= control target key end

     0   :  { %8 = vsyncpa [#allocation5], 0  ;;  %s1394_s0 = inlined_call_operand.hbm [shape: f32[8,2,16,16], index: 0, kind: input, shape index: {}]   ;;  %s1395_s1 = inlined_call_operand.vmem [shape: f32[16,256], index: 1, kind: input, shape index: {}]   ;;  %s1396_s2 = inlined_call_operand.vmem [shape: f32[32,16], index: 2, kind: input, shape index: {}]   ;;  %s1397_s3 = inlined_call_operand.hbm [shape: f32[2,8,128], index: 3, kind: output, shape index: {}]  }
   0x1   :  { %10 = vsyncpa [#allocation5 + $0x1], 0 }
   0x2   :  { %11 = vsyncpa [#allocation6], 0 }
   0x3   :  { %13 = vsyncpa [#allocation6 + $0x1], 0  ;;  %s1136_s12 = smov 0   ;;  %s1138_s13 = smov 0  }
   0x4   :  { %s1140_s14 = smov 0   ;;  %s1142_s15 = smov 0  }
   0x5 LB: > { %s1157_s16 = sadd.s32 4294967295, %s1103_s15   ;;  %s866_s17 = sadd.s32 4294967294, %s1103_s15   ;;  %s1103_s15 = sphi %s1142_s15, %s1410_s15   ;;  %s1099_s14 = sphi %s1140_s14, %s1409_s14   ;;  %s1095_s13 = sphi %s1138_s13, %s1408_s13   ;;  %s1091_s12 = sphi %s1136_s12, %s1407_s12  }
   0x6   : > { %s1161_s18 = sadd.s32 1, %s1103_s15   ;;  %s26_s19 = sadd.s32 1, %s1099_s14 }
   0x7   : > { %s23_s20 = ssub.s32 %s1103_s15, %s1161_s18  ;;  %p33_p0 = scmp.ne.s32.totalorder %s1099_s14, %s1095_s13 }
   0x8   : > { %p24_p1 = scmp.eq.s32.totalorder %s23_s20, 0  ;;  %p34_p2 = scmp.eq.s32.totalorder %s1103_s15, 0 }
   0x9   : > { %p39_p3 = scmp.ne.s32.totalorder %s1095_s13, %s1091_s12  ;;  %p40_p4 = scmp.eq.s32.totalorder %s1157_s16, 0 }
   0xa   : > { %s1173_s21 = scalar_select %p24_p1, %s1099_s14, %s26_s19  }
   0xb   : > { %p1175_p5 = por %p34_p2, %p33_p0  ;;  %p1179_p6 = por %p40_p4, %p39_p3 }
   0xc   : > { %p105_p7 = scmp.eq.s32.totalorder %s1157_s16, 1  ;;  %p111_p8 = scmp.eq.s32.totalorder %s866_s17, 1 }
   0xd   : > { %p948_p10 = scmp.lt.s32.totalorder %s1103_s15, 2  ;;  %s137_s26 = sand.u32 1, %s1099_s14  }
   0xe   : > { %p1186_p11 = por %p105_p7, %p33_p0  ;;  %p1190_p12 = por %p111_p8, %p39_p3 }
   0xf   : > { %s914_s27 = sshll.u32 %s1103_s15, 11  ;;  %s869_s28 = sshll.u32 %s137_s26, 7 }
  0x10   : > { %s1401_s24 = scalar_select %p1186_p11, 1, 0 }
  0x11   : > { %s1402_s25 = scalar_select %p1190_p12, 1, 0 }
  0x12   : > { %s1199_s4 = scalar_lea.hbm %s1394_s0, %s914_s27  ;;  %s141_s5 = scalar_lea.vmem [#allocation4], %s869_s28 }
  0x13   : > { %s149_s6 = sshll.u32 %s141_s5, 4  ;;  %p1203_p13 = pnand %p948_p10, %p1175_p5  ;;  %s1207_s6 = int_to_ptr.vmem [resolvable:$true] %s149_s6 }
  0x14   : > { %s1209_s8 = scalar_lea.sflag [#allocation5], %s137_s26  ;;  %s1003_s9 = scalar_lea.hbm %s1199_s4, 2048 }
  0x15   : > { %p1004_p0 = scmp.ne.s32.totalorder %s1199_s4, %s1003_s9  ;;  %p1005_p1 = pneg %p1203_p13 }
  0x16   : > { %s1008_s17 = scalar_lea.hbm %s1394_s0, 4096  ;;  %p1009_p4 = scmp.lt.u32.totalorder %s1199_s4, %s1394_s0 }
  0x17   : > { %p1006_p2 = pnand %p1005_p1, %p1004_p0  ;;  %p1010_p5 = scmp.lt.u32.totalorder %s1008_s17, %s1003_s9 }
  0x18   : > { %p1012_p8 = scmp.lt.u32.totalorder %s1003_s9, %s1199_s4 }
  0x19   : > { %p1007_p3 = pneg %p1006_p2  ;;  %p1011_p7 = por %p1010_p5, %p1009_p4 }
  0x1b   : > { %p1013_p10 = por %p1012_p8, %p1011_p7 }
  0x1d   : > { %p1014_p9 = pnand %p1013_p10, %p1007_p3 }
  0x1f   : > { %1017 = shalt.err (!%p1014_p9)
}
  0x20   : > { %s1018_s22 = scalar_lea.vmem %s1207_s6, 2048  ;;  %s1109_s26 = smov [#allocation4]  }
  0x21   : > { %p1019_p0 = scmp.ne.s32.totalorder %s1207_s6, %s1018_s22  ;;  %s1023_s27 = sshll.u32 %s1109_s26, 4  ;;  %s1024_s27 = int_to_ptr.vmem [resolvable:$false] %s1023_s27 }
  0x22   : > { %s1025_s28 = scalar_lea.vmem %s1024_s27, 4096  ;;  %p1026_p11 = scmp.lt.s32.totalorder %s1207_s6, %s1024_s27 }
  0x23   : > { %p1021_p2 = pnand %p1019_p0, %p1005_p1  ;;  %p1027_p4 = scmp.lt.s32.totalorder %s1025_s28, %s1018_s22 }
  0x25   : > { %p1022_p12 = pneg %p1021_p2  ;;  %p1028_p5 = por %p1027_p4, %p1026_p11 }
  0x27   : > { %p1029_p7 = pnand %p1028_p5, %p1022_p12 }
  0x29   : > { %1032 = shalt.err (!%p1029_p7)
}
  0x2a   : > { %s1110_s29 = smov 128   ;;  %s1111_s30 = smov 8  }
  0x2b   : > { %943 = dma.hbm_to_vmem [thread:$0]  (!%p1203_p13), %s1199_s4, 2048, %s1207_s6, %s1209_s8, %s1110_s29, %s1110_s29, %s1111_s30  }
  0x2c   : > { %p873_p9 = scmp.ge.s32.totalorder %s1103_s15, 1  ;;  %p157_p1 = scmp.lt.s32.totalorder %s1103_s15, 3 }
  0x2e   : > { %p158_p3 = pnand %p873_p9, %p157_p1 }
  0x2f   : > { %s1240_s5 = sand.u32 (!%p158_p3), 1, %s1095_s13  }
  0x30   : > { %161 = sbr.rel (%p158_p3) target bundleno = 810 (0x32a), region = 32  ;;  %s874_s9 = sshll.u32 (!%p158_p3), %s1240_s5, 7 }
  0x31   : > { %s164_s10 = scalar_lea.sflag (!%p158_p3), [#allocation5], %s1240_s5  ;;  %s1244_s11 = scalar_lea.vmem (!%p158_p3), [#allocation4], %s874_s9 }
  0x37   : > { %1082 = dma.done.wait (%p1179_p6), %s164_s10, 2048  }
  0x38   : > { %1084 = vsyncadd (%p1179_p6), %s164_s10, 4294965248  ;;  %s875_s4 = sshll.u32 %s1240_s5, 3  ;;  %v1112_v0 = vmov 0.0   ;;  %v1254_v1 = vld [vmem:[%s1396_s2] sm:$0xff]  ;;  %v1259_v2 = vld [vmem:[%s1396_s2 + $0x8] sm:$0xff]  ;;  %vm211_vm0 = vcmask 130048  }
  0x39   : > { %324 = vmatprep.mubr.f32.mxu0 %v1112_v0  ;;  %453 = vst [vmem:[#allocation3] sm:$0xff] %v1112_v0  ;;  %454 = vst [vmem:[#allocation3 + $0x8] sm:$0xff] %v1112_v0  ;;  %372 = vmatprep.mubr.f32.mxu1 %v1112_v0  ;;  %v1264_v3 = vld [vmem:[%s1396_s2 + $0x10] sm:$0xff]  ;;  %v1269_v4 = vld [vmem:[%s1396_s2 + $0x18] sm:$0xff]  ;;  %s1319_s7 = smov 0  }
  0x3a   : > { %v208_v5 = vld [vmem:[%s1395_s1 + $0x8] sm:$0xff]  ;;  %v210_v6 = vld [vmem:[%s1395_s1 + $0x18] sm:$0xff]  ;;  %v207_v8 = vld [vmem:[%s1395_s1] sm:$0xff] }
  0x3b   : > { %v920_v7 = vpack.c.bf16 %v210_v6, %v208_v5  ;;  %v209_v9 = vld [vmem:[%s1395_s1 + $0x10] sm:$0xff]  ;;  %v192_v13 = vld [vmem:[%s1244_s11 + $0x8] sm:$0xff]  ;;  %v193_v15 = vld [vmem:[%s1244_s11 + $0x10] sm:$0xff] }
  0x3c   : > { %v922_v10 = vpack.c.bf16 %v209_v9, %v207_v8  ;;  %v191_v11 = vld [vmem:[%s1244_s11] sm:$0xff]  ;;  %v200_v14 = vld [vmem:[%s1244_s11 + $0x48] sm:$0xff]  ;;  %v201_v16 = vld [vmem:[%s1244_s11 + $0x50] sm:$0xff] }
  0x3d   : > { %921 = vmatprep.subr.bf16.mxu0 %v920_v7  ;;  %932 = vmatprep.subr.bf16.mxu1 %v920_v7  ;;  %v199_v12 = vld [vmem:[%s1244_s11 + $0x40] sm:$0xff]  ;;  %v194_v17 = vld [vmem:[%s1244_s11 + $0x18] sm:$0xff]  ;;  %v196_v21 = vld [vmem:[%s1244_s11 + $0x28] sm:$0xff] }
  0x3e   : > { %923 = vmatpush1.bf16.msra.mxu0 %v922_v10  ;;  %933 = vmatpush1.bf16.msra.mxu1 %v922_v10  ;;  %v202_v18 = vld [vmem:[%s1244_s11 + $0x58] sm:$0xff]  ;;  %v195_v19 = vld [vmem:[%s1244_s11 + $0x20] sm:$0xff]  ;;  %v204_v22 = vld [vmem:[%s1244_s11 + $0x68] sm:$0xff] }
  0x3f   : > { %v203_v20 = vld [vmem:[%s1244_s11 + $0x60] sm:$0xff]  ;;  %v197_v23 = vld [vmem:[%s1244_s11 + $0x30] sm:$0xff]  ;;  %v198_v25 = vld [vmem:[%s1244_s11 + $0x38] sm:$0xff] }
  0x40   : > { %v205_v24 = vld [vmem:[%s1244_s11 + $0x70] sm:$0xff]  ;;  %v206_v26 = vld [vmem:[%s1244_s11 + $0x78] sm:$0xff]  ;;  %s1317_s11 = scalar_lea.vmem [#allocation7], %s875_s4 }
  0x41   : > { %876 = vmatmul.mubr.msk.f32.vlgmr.msra.gmra.mrb[0].mxu0 %vm211_vm0, %v191_v11  ;;  %884 = vmatmul.mubr.msk.f32.vlgmr.msra.gmra.mrb[0].mxu1 %vm211_vm0, %v199_v12 }
  0x42   : > { %330 = vmatprep.mubr.f32.mxu0 %v1112_v0  ;;  %378 = vmatprep.mubr.f32.mxu1 %v1112_v0 }
  0x45   : > { %877 = vmatmul.mubr.msk.f32.gmra.mrb[2].mxu0 %vm211_vm0, %v192_v13  ;;  %885 = vmatmul.mubr.msk.f32.gmra.mrb[2].mxu1 %vm211_vm0, %v200_v14 }
  0x46   : > { %336 = vmatprep.mubr.f32.mxu0 %v1112_v0  ;;  %384 = vmatprep.mubr.f32.mxu1 %v1112_v0 }
  0x49   : > { %878 = vmatmul.mubr.msk.f32.gmra.mrb[4].mxu0 %vm211_vm0, %v193_v15  ;;  %886 = vmatmul.mubr.msk.f32.gmra.mrb[4].mxu1 %vm211_vm0, %v201_v16 }
  0x4a   : > { %342 = vmatprep.mubr.f32.mxu0 %v1112_v0  ;;  %390 = vmatprep.mubr.f32.mxu1 %v1112_v0 }
  0x4d   : > { %879 = vmatmul.mubr.msk.f32.gmra.mrb[6].mxu0 %vm211_vm0, %v194_v17  ;;  %887 = vmatmul.mubr.msk.f32.gmra.mrb[6].mxu1 %vm211_vm0, %v202_v18 }
  0x4e   : > { %348 = vmatprep.mubr.f32.mxu0 %v1112_v0  ;;  %396 = vmatprep.mubr.f32.mxu1 %v1112_v0 }
  0x51   : > { %880 = vmatmul.mubr.msk.f32.gmra.mrb[8].mxu0 %vm211_vm0, %v195_v19  ;;  %888 = vmatmul.mubr.msk.f32.gmra.mrb[8].mxu1 %vm211_vm0, %v203_v20 }
  0x52   : > { %354 = vmatprep.mubr.f32.mxu0 %v1112_v0  ;;  %402 = vmatprep.mubr.f32.mxu1 %v1112_v0 }
  0x55   : > { %881 = vmatmul.mubr.msk.f32.gmra.mrb[10].mxu0 %vm211_vm0, %v196_v21  ;;  %889 = vmatmul.mubr.msk.f32.gmra.mrb[10].mxu1 %vm211_vm0, %v204_v22 }
  0x56   : > { %360 = vmatprep.mubr.f32.mxu0 %v1112_v0  ;;  %408 = vmatprep.mubr.f32.mxu1 %v1112_v0 }
  0x59   : > { %882 = vmatmul.mubr.msk.f32.gmra.mrb[12].mxu0 %vm211_vm0, %v197_v23  ;;  %890 = vmatmul.mubr.msk.f32.gmra.mrb[12].mxu1 %vm211_vm0, %v205_v24 }
  0x5a   : > { %366 = vmatprep.mubr.f32.mxu0 %v1112_v0  ;;  %414 = vmatprep.mubr.f32.mxu1 %v1112_v0 }
  0x5d   : > { %883 = vmatmul.mubr.msk.f32.gmra.mrb[14].mxu0 %vm211_vm0, %v198_v25  ;;  %891 = vmatmul.mubr.msk.f32.gmra.mrb[14].mxu1 %vm211_vm0, %v206_v26 }
 0x114   : > { %v326_v27 = vpop.f32.mrb[0].mxu0  ;;  %v374_v28 = vpop.f32.mrb[0].mxu1 }
 0x115   : > { %421 = vst [vmem:[#allocation2] sm:$0xff] %v326_v27  ;;  %437 = vst [vmem:[#allocation2 + $0x80] sm:$0xff] %v374_v28  ;;  %v328_v29 = vpop.f32.mrb[1].mxu0  ;;  %v376_v30 = vpop.f32.mrb[1].mxu1 }
 0x116   : > { %422 = vst [vmem:[#allocation2 + $0x8] sm:$0xff] %v328_v29  ;;  %438 = vst [vmem:[#allocation2 + $0x88] sm:$0xff] %v376_v30 }
 0x118   : > { %v332_v31 = vpop.f32.mrb[2].mxu0  ;;  %v380_v32 = vpop.f32.mrb[2].mxu1 }
 0x119   : > { %423 = vst [vmem:[#allocation2 + $0x10] sm:$0xff] %v332_v31  ;;  %439 = vst [vmem:[#allocation2 + $0x90] sm:$0xff] %v380_v32  ;;  %v334_v33 = vpop.f32.mrb[3].mxu0  ;;  %v382_v34 = vpop.f32.mrb[3].mxu1 }
 0x11a   : > { %424 = vst [vmem:[#allocation2 + $0x18] sm:$0xff] %v334_v33  ;;  %440 = vst [vmem:[#allocation2 + $0x98] sm:$0xff] %v382_v34 }
 0x11c   : > { %v338_v35 = vpop.f32.mrb[4].mxu0  ;;  %v386_v36 = vpop.f32.mrb[4].mxu1 }
 0x11d   : > { %425 = vst [vmem:[#allocation2 + $0x20] sm:$0xff] %v338_v35  ;;  %441 = vst [vmem:[#allocation2 + $0xa0] sm:$0xff] %v386_v36  ;;  %v340_v37 = vpop.f32.mrb[5].mxu0  ;;  %v388_v38 = vpop.f32.mrb[5].mxu1 }
 0x11e   : > { %426 = vst [vmem:[#allocation2 + $0x28] sm:$0xff] %v340_v37  ;;  %442 = vst [vmem:[#allocation2 + $0xa8] sm:$0xff] %v388_v38 }
 0x120   : > { %v344_v39 = vpop.f32.mrb[6].mxu0  ;;  %v392_v40 = vpop.f32.mrb[6].mxu1 }
 0x121   : > { %427 = vst [vmem:[#allocation2 + $0x30] sm:$0xff] %v344_v39  ;;  %443 = vst [vmem:[#allocation2 + $0xb0] sm:$0xff] %v392_v40  ;;  %v346_v41 = vpop.f32.mrb[7].mxu0  ;;  %v394_v42 = vpop.f32.mrb[7].mxu1 }
 0x122   : > { %428 = vst [vmem:[#allocation2 + $0x38] sm:$0xff] %v346_v41  ;;  %444 = vst [vmem:[#allocation2 + $0xb8] sm:$0xff] %v394_v42 }
 0x124   : > { %v350_v43 = vpop.f32.mrb[8].mxu0  ;;  %v398_v44 = vpop.f32.mrb[8].mxu1 }
 0x125   : > { %429 = vst [vmem:[#allocation2 + $0x40] sm:$0xff] %v350_v43  ;;  %445 = vst [vmem:[#allocation2 + $0xc0] sm:$0xff] %v398_v44  ;;  %v352_v45 = vpop.f32.mrb[9].mxu0  ;;  %v400_v46 = vpop.f32.mrb[9].mxu1 }
 0x126   : > { %430 = vst [vmem:[#allocation2 + $0x48] sm:$0xff] %v352_v45  ;;  %446 = vst [vmem:[#allocation2 + $0xc8] sm:$0xff] %v400_v46 }
 0x128   : > { %v356_v47 = vpop.f32.mrb[10].mxu0  ;;  %v404_v48 = vpop.f32.mrb[10].mxu1 }
 0x129   : > { %431 = vst [vmem:[#allocation2 + $0x50] sm:$0xff] %v356_v47  ;;  %447 = vst [vmem:[#allocation2 + $0xd0] sm:$0xff] %v404_v48  ;;  %v358_v49 = vpop.f32.mrb[11].mxu0  ;;  %v406_v50 = vpop.f32.mrb[11].mxu1 }
 0x12a   : > { %432 = vst [vmem:[#allocation2 + $0x58] sm:$0xff] %v358_v49  ;;  %448 = vst [vmem:[#allocation2 + $0xd8] sm:$0xff] %v406_v50 }
 0x12c   : > { %v362_v51 = vpop.f32.mrb[12].mxu0  ;;  %v410_v52 = vpop.f32.mrb[12].mxu1 }
 0x12d   : > { %433 = vst [vmem:[#allocation2 + $0x60] sm:$0xff] %v362_v51  ;;  %449 = vst [vmem:[#allocation2 + $0xe0] sm:$0xff] %v410_v52  ;;  %v364_v53 = vpop.f32.mrb[13].mxu0  ;;  %v412_v54 = vpop.f32.mrb[13].mxu1 }
 0x12e   : > { %434 = vst [vmem:[#allocation2 + $0x68] sm:$0xff] %v364_v53  ;;  %450 = vst [vmem:[#allocation2 + $0xe8] sm:$0xff] %v412_v54 }
 0x130   : > { %v368_v55 = vpop.f32.mrb[14].mxu0  ;;  %v416_v56 = vpop.f32.mrb[14].mxu1 }
 0x131   : > { %435 = vst [vmem:[#allocation2 + $0x70] sm:$0xff] %v368_v55  ;;  %451 = vst [vmem:[#allocation2 + $0xf0] sm:$0xff] %v416_v56  ;;  %v370_v57 = vpop.f32.mrb[15].mxu0  ;;  %v418_v58 = vpop.f32.mrb[15].mxu1 }
 0x132   : > { %436 = vst [vmem:[#allocation2 + $0x78] sm:$0xff] %v370_v57  ;;  %452 = vst [vmem:[#allocation2 + $0xf8] sm:$0xff] %v418_v58 }
 0x133 LB: >> { %v1113_v59 = vmov 0.0   ;;  %s892_s8 = sshll.u32 %s1107_s7, 5  ;;  %s464_s7 = sadd.s32 1, %s1107_s7   ;;  %s1107_s7 = sphi %s1319_s7, %s464_s7  }
 0x134   : >> { %551 = vmatprep.mubr.f32.mxu0 %v1113_v59  ;;  %676 = vmatprep.mubr.f32.mxu1 %v1113_v59  ;;  %s466_s17 = sshra.s32 %s892_s8, 3  ;;  %s917_s23 = sadd.s32 16, %s892_s8 }
 0x135   : >> { %s915_s19 = sshll.u32 %s466_s17, 4  ;;  %s603_s20 = sshra.s32 %s917_s23, 3 }
 0x136   : >> { %s918_s22 = sshll.u32 %s603_s20, 4  ;;  %s470_s26 = scalar_lea.vmem [#allocation2], %s915_s19 }
 0x137   : >> { %s607_s4 = scalar_lea.vmem [#allocation2], %s918_s22  ;;  %p461_p6 = scmp.ge.s32.totalorder %s464_s7, 4  }
 0x138   : > { %s910_s27 = sshll.u32 (%p461_p6), %s1157_s16, 7  ;;  %s787_s28 = sshll.u32 (%p461_p6), %s1317_s11, 4  ;;  %s1351_s28 = int_to_ptr.vmem [resolvable:$true] %s787_s28 }
 0x139   : >> { %v472_v60 = vld [vmem:[%s470_s26 + $0x8] sm:$0xff]  ;;  %v474_v61 = vld [vmem:[%s470_s26 + $0x18] sm:$0xff]  ;;  %v471_v62 = vld [vmem:[%s470_s26] sm:$0xff]  ;;  %s1349_s9 = scalar_lea.hbm (%p461_p6), %s1397_s3, %s910_s27  ;;  %s774_s6 = scalar_lea.sflag (%p461_p6), [#allocation6], %s1240_s5 }
 0x13a   : >> { %v924_v63 = vpack.c.bf16 %v474_v61, %v472_v60  ;;  %v473_v0 = vld [vmem:[%s470_s26 + $0x10] sm:$0xff]  ;;  %v609_v5 = vld [vmem:[%s607_s4 + $0x8] sm:$0xff]  ;;  %v611_v6 = vld [vmem:[%s607_s4 + $0x18] sm:$0xff]  ;;  %s1033_s7 = scalar_lea.vmem (%p461_p6), %s1351_s28, 128  ;;  %p1404_p12 = scmp.ne.s32.totalorder (%p461_p6), %s1401_s24, 0 }
 0x13b   : >> { %v926_v7 = vpack.c.bf16 %v473_v0, %v471_v62  ;;  %v928_v8 = vpack.c.bf16 %v611_v6, %v609_v5  ;;  %v608_v9 = vld [vmem:[%s607_s4] sm:$0xff]  ;;  %v610_v10 = vld [vmem:[%s607_s4 + $0x10] sm:$0xff]  ;;  %p1034_p11 = scmp.ne.s32.totalorder (%p461_p6), %s1351_s28, %s1033_s7  ;;  %s1115_s16 = smov (%p461_p6), [#allocation7]  }
 0x13c   : >> { %925 = vmatprep.subr.bf16.mxu0 %v924_v63  ;;  %v930_v11 = vpack.c.bf16 %v610_v10, %v608_v9  ;;  %s1037_s8 = sshll.u32 (%p461_p6), %s1115_s16, 4  ;;  %s1038_s8 = int_to_ptr.vmem [resolvable:$false] %s1037_s8 }
 0x13d   : >> { %927 = vmatpush1.bf16.msra.mxu0 %v926_v7  ;;  %929 = vmatprep.subr.bf16.mxu1 %v928_v8  ;;  %p1035_p13 = pnand (%p461_p6), %p1034_p11, %p1404_p12  ;;  %s1039_s17 = scalar_lea.vmem (%p461_p6), %s1038_s8, 256 }
 0x13e   : >> { %931 = vmatpush1.bf16.msra.mxu1 %v930_v11  ;;  %p1040_p10 = scmp.lt.s32.totalorder (%p461_p6), %s1351_s28, %s1038_s8  ;;  %p1041_p0 = scmp.lt.s32.totalorder (%p461_p6), %s1039_s17, %s1033_s7 }
 0x13f   : > { %p1036_p8 = pneg (%p461_p6), %p1035_p13 }
 0x140   : >> { %895 = vmatmul.mubr.msk.f32.vlgmr.msra.gmra.mrb[0].mxu0 %vm211_vm0, %v1254_v1  ;;  %p1042_p2 = por (%p461_p6), %p1041_p0, %p1040_p10 }
 0x141   : >> { %903 = vmatmul.mubr.msk.f32.vlgmr.msra.gmra.mrb[0].mxu1 %vm211_vm0, %v1254_v1  ;;  %557 = vmatprep.mubr.f32.mxu0 %v1113_v59 }
 0x142   : >> { %682 = vmatprep.mubr.f32.mxu1 %v1113_v59  ;;  %p1043_p4 = pnand (%p461_p6), %p1042_p2, %p1036_p8 }
 0x144   : >> { %896 = vmatmul.mubr.msk.f32.gmra.mrb[2].mxu0 %vm211_vm0, %v1259_v2 }
 0x145   : >> { %904 = vmatmul.mubr.msk.f32.gmra.mrb[2].mxu1 %vm211_vm0, %v1259_v2  ;;  %563 = vmatprep.mubr.f32.mxu0 %v1113_v59 }
 0x146   : >> { %688 = vmatprep.mubr.f32.mxu1 %v1113_v59 }
 0x148   : >> { %897 = vmatmul.mubr.msk.f32.gmra.mrb[4].mxu0 %vm211_vm0, %v1264_v3 }
 0x149   : >> { %905 = vmatmul.mubr.msk.f32.gmra.mrb[4].mxu1 %vm211_vm0, %v1264_v3  ;;  %569 = vmatprep.mubr.f32.mxu0 %v1113_v59 }
 0x14a   : >> { %694 = vmatprep.mubr.f32.mxu1 %v1113_v59 }
 0x14c   : >> { %898 = vmatmul.mubr.msk.f32.gmra.mrb[6].mxu0 %vm211_vm0, %v1269_v4 }
 0x14d   : >> { %906 = vmatmul.mubr.msk.f32.gmra.mrb[6].mxu1 %vm211_vm0, %v1269_v4 }
 0x213   : >> { %v553_v12 = vpop.f32.mrb[0].mxu0 }
 0x214   : >> { %v555_v13 = vpop.f32.mrb[1].mxu0  ;;  %v678_v14 = vpop.f32.mrb[0].mxu1 }
 0x215   : >> { %v680_v15 = vpop.f32.mrb[1].mxu1 }
 0x217   : >> { %v559_v16 = vpop.f32.mrb[2].mxu0 }
 0x218   : >> { %v561_v17 = vpop.f32.mrb[3].mxu0  ;;  %v684_v18 = vpop.f32.mrb[2].mxu1 }
 0x219   : >> { %v686_v19 = vpop.f32.mrb[3].mxu1 }
 0x21b   : >> { %v565_v20 = vpop.f32.mrb[4].mxu0 }
 0x21c   : >> { %v578_v21 = vadd.f32 %v565_v20, %v555_v13  ;;  %v567_v22 = vpop.f32.mrb[5].mxu0  ;;  %v690_v23 = vpop.f32.mrb[4].mxu1  ;;  %v729_v13 = vld [vmem:[#allocation3] sm:$0xff] }
 0x21d   : >> { %v576_v24 = vsub.f32 %v553_v12, %v567_v22  ;;  %v703_v25 = vadd.f32 %v690_v23, %v680_v15  ;;  %v692_v26 = vpop.f32.mrb[5].mxu1 }
 0x21e   : >> { %v582_v27 = vmul.f32 %v578_v21, %v578_v21  ;;  %v701_v28 = vsub.f32 %v678_v14, %v692_v26 }
 0x21f   : >> { %v580_v29 = vmul.f32 %v576_v24, %v576_v24  ;;  %v707_v30 = vmul.f32 %v703_v25, %v703_v25  ;;  %v571_v31 = vpop.f32.mrb[6].mxu0  ;;  %v730_v24 = vld [vmem:[#allocation3 + $0x8] sm:$0xff] }
 0x220   : >> { %v705_v32 = vmul.f32 %v701_v28, %v701_v28  ;;  %v579_v33 = vadd.f32 %v571_v31, %v561_v17  ;;  %v573_v34 = vpop.f32.mrb[7].mxu0  ;;  %v696_v35 = vpop.f32.mrb[6].mxu1  ;;  %v749_v28 = vlaneseq (%p461_p6) }
 0x221   : >> { %v584_v36 = vadd.f32 %v582_v27, %v580_v29  ;;  %v577_v37 = vsub.f32 %v559_v16, %v573_v34  ;;  %v704_v38 = vadd.f32 %v696_v35, %v686_v19  ;;  %v698_v39 = vpop.f32.mrb[7].mxu1 }
 0x222   : >> { %v709_v40 = vadd.f32 %v707_v30, %v705_v32  ;;  %v702_v41 = vsub.f32 %v684_v18, %v698_v39  ;;  %v583_v42 = vmul.f32 %v579_v33, %v579_v33  ;;  %v750_v29 = vand.u32 (%p461_p6), 127, %v749_v28 }
 0x223   : >> { %995 = vrsqrt.f32 %v584_v36  ;;  %v581_v43 = vmul.f32 %v577_v37, %v577_v37  ;;  %v708_v44 = vmul.f32 %v704_v38, %v704_v38  ;;  %vm588_vm1 = vcmp.eq.f32.partialorder %v584_v36, inf }
 0x224   : >> { %997 = vrsqrt.f32 %v709_v40  ;;  %v706_v45 = vmul.f32 %v702_v41, %v702_v41  ;;  %v591_v51 = vand.u32 2147483648, %v584_v36  ;;  %vm590_vm2 = vcmp.eq.f32.partialorder %v584_v36, 0.0 }
 0x225   : >> { %v585_v46 = vadd.f32 %v583_v42, %v581_v43  ;;  %vm713_vm3 = vcmp.eq.f32.partialorder %v709_v40, inf  ;;  %v716_v54 = vand.u32 2147483648, %v709_v40  ;;  %vm715_vm4 = vcmp.eq.f32.partialorder %v709_v40, 0.0 }
 0x226   : >> { %v710_v47 = vadd.f32 %v708_v44, %v706_v45  ;;  %vm751_vm11 = vcmp.eq.s32.totalorder (%p461_p6), %v750_v29, 0  ;;  %vm753_vm12 = vcmp.eq.s32.totalorder (%p461_p6), %v750_v29, 8  ;;  %vm755_vm13 = vcmp.ge.s32.totalorder (%p461_p6), %v750_v29, 9 }
 0x227   : >> { %999 = vrsqrt.f32 %v585_v46  ;;  %vm595_vm5 = vcmp.eq.f32.partialorder %v585_v46, inf  ;;  %v598_v0 = vand.u32 2147483648, %v585_v46  ;;  %vm597_vm6 = vcmp.eq.f32.partialorder %v585_v46, 0.0 }
 0x228   : >> { %1001 = vrsqrt.f32 %v710_v47  ;;  %vm720_vm7 = vcmp.eq.f32.partialorder %v710_v47, inf  ;;  %v723_v7 = vand.u32 2147483648, %v710_v47  ;;  %vm722_vm9 = vcmp.eq.f32.partialorder %v710_v47, 0.0 }
 0x229   : > { %v1114_v30 = vmov (%p461_p6), 2.0  }
 0x22a   : > { %v752_v31 = vsel (%p461_p6), %vm751_vm11, 1.0, %v1114_v30 }
 0x22b   : > { %v754_v34 = vsel (%p461_p6), %vm753_vm12, 1.0, %v752_v31 }
 0x22c   : > { %v756_v35 = vsel (%p461_p6), %vm755_vm13, 0.0, %v754_v34 }
 0x22d   : >> { %v996_v48 = vpop.eup %995 }
 0x22e   : >> { %v998_v49 = vpop.eup %997  ;;  %v587_v50 = vmul.f32 %v996_v48, %v584_v36 }
 0x22f   : >> { %v712_v52 = vmul.f32 %v998_v49, %v709_v40 }
 0x230   : >> { %v589_v53 = vsel %vm588_vm1, %v584_v36, %v587_v50 }
 0x231   : >> { %v592_v55 = vsel %vm590_vm2, %v591_v51, %v589_v53  ;;  %v714_v56 = vsel %vm713_vm3, %v709_v40, %v712_v52  ;;  %v1000_v58 = vpop.eup %999 }
 0x232   : >> { %v717_v57 = vsel %vm715_vm4, %v716_v54, %v714_v56  ;;  %v1002_v60 = vpop.eup %1001  ;;  %v594_v61 = vmul.f32 %v1000_v58, %v585_v46 }
 0x233   : >> { %v725_v59 = vsub.f32 %v717_v57, %v592_v55  ;;  %v719_v5 = vmul.f32 %v1002_v60, %v710_v47 }
 0x234   : >> { %v596_v6 = vsel %vm595_vm5, %v585_v46, %v594_v61 }
 0x235   : >> { %v727_v62 = vand.u32 2147483647, %v725_v59  ;;  %v735_v63 = vmul.f32 0.5, %v725_v59  ;;  %v599_v10 = vsel %vm597_vm6, %v598_v0, %v596_v6  ;;  %v731_v11 = vmul.f32 %v725_v59, %v725_v59 }
 0x236   : >> { %v721_v12 = vsel %vm720_vm7, %v710_v47, %v719_v5 }
 0x237   : >> { %vm733_vm8 = vcmp.lt.f32.partialorder %v727_v62, 1.0  ;;  %v737_v8 = vmul.f32 %v735_v63, %v725_v59  ;;  %v907_v9 = vadd.f32 -0.5, %v727_v62  ;;  %v724_v15 = vsel %vm722_vm9, %v723_v7, %v721_v12 }
 0x238   : >> { %v726_v17 = vsub.f32 %v724_v15, %v599_v10 }
 0x239   : >> { %v741_v14 = vsel %vm733_vm8, %v737_v8, %v907_v9 }
 0x23a   : >> { %v743_v16 = vadd.f32 %v741_v14, %v731_v11  ;;  %v728_v19 = vand.u32 2147483647, %v726_v17  ;;  %v736_v20 = vmul.f32 0.5, %v726_v17  ;;  %v732_v23 = vmul.f32 %v726_v17, %v726_v17 }
 0x23c   : >> { %v745_v18 = vadd.f32 %v743_v16, %v729_v13  ;;  %vm734_vm10 = vcmp.lt.f32.partialorder %v728_v19, 1.0  ;;  %v738_v21 = vmul.f32 %v736_v20, %v726_v17  ;;  %v908_v22 = vadd.f32 -0.5, %v728_v19 }
 0x23d   : > { %463 = sbr.rel (!%p461_p6) target bundleno = 307 (0x133), region = 86 }
 0x23e   : >> { %747 = vst [vmem:[#allocation3] sm:$0xff] %v745_v18  ;;  %v742_v25 = vsel %vm734_vm10, %v738_v21, %v908_v22 }
 0x23f   : >> { %v744_v26 = vadd.f32 %v742_v25, %v732_v23 }
 0x241   : >> { %v746_v27 = vadd.f32 %v744_v26, %v730_v24 }
 0x243   : >> { %748 = vst [vmem:[#allocation3 + $0x8] sm:$0xff] %v746_v27 }
 0x245   : > { %v757_v32 = vld [vmem:[#allocation3] sm:$0xff] }
 0x246   : > { %v759_v36 = vmul.f32 %v757_v32, %v756_v35 }
 0x24a   : > { %v758_v33 = vld [vmem:[#allocation3 + $0x8] sm:$0xff] }
 0x24b   : > { %v760_v37 = vmul.f32 %v758_v33, %v756_v35 }
 0x24d   : > { %v761_v38 = vadd.f32 %v760_v37, %v759_v36 }
 0x24f   : > { %762 = vadd.xlane.f32.xlu0 %v761_v38 }
 0x2dc   : > { %v763_v39 = vpop.xlane.xlu0 %762 }
 0x2dd   : > { %v764_v1 = vrot.slane %v763_v39, 4 }
 0x2df   : > { %v765_v2 = vadd.f32 %v764_v1, %v763_v39 }
 0x2e1   : > { %v766_v3 = vrot.slane %v765_v2, 2 }
 0x2e3   : > { %v767_v4 = vadd.f32 %v766_v3, %v765_v2 }
 0x2e5   : > { %v768_v40 = vrot.slane %v767_v4, 1 }
 0x2e7   : > { %v769_v41 = vadd.f32 %v768_v40, %v767_v4 }
 0x2e9   : > { %934 = vpush %v769_v41 }
 0x31a   : > { %s935_s10 = spop %934 }
 0x31b   : > { %v771_v42 = vstv %s935_s10 }
 0x31c   : > { %772 = vst [vmem:[%s1317_s11] sm:$0xff] %v771_v42 }
 0x31d   : > { %1046 = shalt.err (!%p1043_p4)
}
 0x31e   : > { %s1047_s5 = scalar_lea.hbm %s1349_s9, 128  ;;  %s1051_s19 = scalar_lea.hbm %s1397_s3, 256 }
 0x31f   : > { %p1048_p5 = scmp.ne.s32.totalorder %s1349_s9, %s1047_s5  ;;  %p1052_p1 = scmp.lt.u32.totalorder %s1349_s9, %s1397_s3 }
 0x320   : > { %p1053_p3 = scmp.lt.u32.totalorder %s1051_s19, %s1047_s5  ;;  %p1055_p11 = scmp.lt.u32.totalorder %s1047_s5, %s1349_s9 }
 0x321   : > { %p1049_p7 = pnand %p1048_p5, %p1404_p12 }
 0x322   : > { %p1054_p6 = por %p1053_p3, %p1052_p1 }
 0x323   : > { %p1050_p9 = pneg %p1049_p7 }
 0x324   : > { %p1056_p13 = por %p1055_p11, %p1054_p6 }
 0x326   : > { %p1057_p8 = pnand %p1056_p13, %p1050_p9 }
 0x328   : > { %1060 = shalt.err (!%p1057_p8)
}
 0x329   : > { %938 = dma.vmem_to_hbm [thread:$0]  (%p1404_p12), %s1351_s28, 128, %s1349_s9, %s774_s6  }
 0x32a PF: > { %s799_s26 = sand.u32 1, %s1091_s12   ;;  %p1405_p10 = scmp.ne.s32.totalorder %s1402_s25, 0 }
 0x32b   : > { %p1406_p0 = scmp.ge.s32.totalorder %s1103_s15, 2  ;;  %s800_s4 = scalar_lea.sflag [#allocation6], %s799_s26 }
 0x32d   : > { %p945_p2 = pnand %p1406_p0, %p1405_p10 }
 0x32f   : > { %1086 = dma.done.wait (!%p945_p2), %s800_s4, 128  }
 0x330   : > { %1088 = vsyncadd (!%p945_p2), %s800_s4, 4294967168  ;;  %p16_p4 = scmp.ge.s32.totalorder %s1161_s18, 4   ;;  %s1407_s12 = smov %s1095_s13 }
 0x331   : > { %s1408_s13 = smov %s1099_s14  ;;  %s1409_s14 = smov %s1173_s21 }
 0x332   : > { %s1410_s15 = smov %s1161_s18  ;;  %18 = sbr.rel (!%p16_p4) target bundleno = 5 (0x5), region = 97 }
 0x339   :  { %805 = vsyncpa [#allocation5], 1 }
 0x33a   :  { %807 = vsyncpa [#allocation5 + $0x1], 1 }
 0x33b   :  { %808 = vsyncpa [#allocation6], 1 }
 0x33c   :  { %810 = vsyncpa [#allocation6 + $0x1], 1 }

</bundles_post_ra>
